<compile_context>
chip_gen: v7x
topology: tpu7x:2x2x1
jax: 0.10.0
libtpu: 0.0.40
codegen_flags: <defaults>
</compile_context>

<pallas_src>
import functools

import jax
import jax.numpy as jnp
from jax.experimental import pallas as pl
from jax.experimental.pallas import tpu as pltpu


def _round_up(x, m):
    return ((x + m - 1) // m) * m


# ----------------------------------------------------------------------------
# Pallas kernel: out_tile = relu(patch_tile @ weight_tile + bias_tile)
#   p_ref: (TM, K)   w_ref: (K, TN)   b_ref: (1, TN)   o_ref: (TM, TN)
# ----------------------------------------------------------------------------
def _matmul_bias_relu_kernel(p_ref, w_ref, b_ref, o_ref):
    acc = jnp.dot(p_ref[...], w_ref[...], preferred_element_type=jnp.float32)
    o_ref[...] = jnp.maximum(acc + b_ref[...], 0.0).astype(o_ref.dtype)


def _pallas_matmul_bias_relu(patches, w2d, bias2d, tm=512, tn=512):
    M, K = patches.shape
    Kw, Coutp = w2d.shape
    assert Kw == K and Coutp % 128 == 0

    # Tile over M (sublane-aligned); pad M up to a multiple of TM so every
    # block is full (padded rows are sliced off below).
    tm = min(tm, _round_up(M, 8))
    Mp = _round_up(M, tm)
    if Mp != M:
        patches = jnp.pad(patches, ((0, Mp - M), (0, 0)))

    # Tile over Cout (lane-aligned); Coutp is already a multiple of 128.
    tn = min(tn, Coutp)

    out = pl.pallas_call(
        _matmul_bias_relu_kernel,
        out_shape=jax.ShapeDtypeStruct((Mp, Coutp), jnp.float32),
        grid_spec=pltpu.PrefetchScalarGridSpec(
            num_scalar_prefetch=0,
            grid=(Mp // tm, Coutp // tn),       # Cout axis innermost:
            in_specs=[                           # patch tile resident across it
                pl.BlockSpec((tm, K), lambda i, j: (i, 0)),   # patch tile
                pl.BlockSpec((K, tn), lambda i, j: (0, j)),   # weight tile
                pl.BlockSpec((1, tn), lambda i, j: (0, j)),   # bias tile
            ],
            out_specs=pl.BlockSpec((tm, tn), lambda i, j: (i, j)),
        ),
        compiler_params=pltpu.CompilerParams(
            dimension_semantics=("parallel", "parallel"),  # v7x: 2 TCs
            vmem_limit_bytes=32 * 1024 * 1024,
        ),
    )(patches, w2d, bias2d)
    return out[:M]


# ----------------------------------------------------------------------------
# im2col in NHWC: shifted slices concatenated on the channel axis
# -> (N*Ho*Wo, KH*KW*Cin) with (kh, kw, c) minor ordering, no 5-D transpose.
# ----------------------------------------------------------------------------
def _im2col_nhwc(x, k, stride, padding):
    N, H, W, C = x.shape
    Ho = (H + 2 * padding - k) // stride + 1
    Wo = (W + 2 * padding - k) // stride + 1
    xp = jnp.pad(x, ((0, 0), (padding, padding), (padding, padding), (0, 0)))
    taps = []
    for kh in range(k):
        for kw in range(k):
            taps.append(
                xp[:, kh:kh + stride * Ho:stride, kw:kw + stride * Wo:stride, :])
    patches = jnp.concatenate(taps, axis=-1).reshape(N * Ho * Wo, k * k * C)
    return patches, (N, Ho, Wo)


def _conv2d_relu_nhwc(x, weight, bias, stride, use_bf16=False):
    # weight: (Cout, Cin, KH, KW)  (PyTorch OIHW layout)
    Cout, Cin, KH, KW = weight.shape
    padding = (KH - 1) // 2
    patches, (N, Ho, Wo) = _im2col_nhwc(x, KH, stride, padding)

    # Flatten weight rows in (kh, kw, cin) order to match the patch layout.
    w2d = jnp.transpose(weight, (2, 3, 1, 0)).reshape(KH * KW * Cin, Cout)

    # Lane-dense output: zero-pad Cout up to a multiple of 128.
    Coutp = _round_up(Cout, 128)
    w2d = jnp.pad(w2d, ((0, 0), (0, Coutp - Cout)))
    b2d = jnp.pad(bias, (0, Coutp - Cout)).reshape(1, Coutp).astype(jnp.float32)

    if use_bf16:  # v6e/v7x MXU peak; accumulation stays f32 in the kernel.
        patches = patches.astype(jnp.bfloat16)
        w2d = w2d.astype(jnp.bfloat16)

    out = _pallas_matmul_bias_relu(patches, w2d, b2d)          # (M, Coutp) f32
    return out[:, :Cout].reshape(N, Ho, Wo, Cout)              # stay NHWC


# ----------------------------------------------------------------------------
# DownSample: conv1 (stride s) -> ReLU -> conv2 (stride 1, s*C channels) -> ReLU
# ----------------------------------------------------------------------------
def init_downsample_params(key, in_channels, kernel_size=3, stride=2):
    k1, k2, k3, k4 = jax.random.split(key, 4)
    fan_in = in_channels * kernel_size * kernel_size
    bound = 1.0 / jnp.sqrt(fan_in)
    w1 = jax.random.uniform(k1, (in_channels, in_channels, kernel_size, kernel_size),
                            jnp.float32, -bound, bound)
    b1 = jax.random.uniform(k2, (in_channels,), jnp.float32, -bound, bound)
    w2 = jax.random.uniform(k3, (stride * in_channels, in_channels, kernel_size, kernel_size),
                            jnp.float32, -bound, bound)
    b2 = jax.random.uniform(k4, (stride * in_channels,), jnp.float32, -bound, bound)
    return {"w1": w1, "b1": b1, "w2": w2, "b2": b2, "stride": stride}


@functools.partial(jax.jit, static_argnames=("stride", "use_bf16"))
def downsample_forward(x, w1, b1, w2, b2, stride=2, use_bf16=False):
    # Single NCHW->NHWC transpose in, single NHWC->NCHW out; the intermediate
    # between the two convs never leaves NHWC.
    x_nhwc = jnp.transpose(x, (0, 2, 3, 1))
    h = _conv2d_relu_nhwc(x_nhwc, w1, b1, stride=stride, use_bf16=use_bf16)
    h = _conv2d_relu_nhwc(h, w2, b2, stride=1, use_bf16=use_bf16)
    return jnp.transpose(h, (0, 3, 1, 2))


# ----------------------------------------------------------------------------
# Pure-JAX reference for validation
# ----------------------------------------------------------------------------
def _ref_forward(x, w1, b1, w2, b2, stride=2):
    def conv(x, w, b, s):
        y = jax.lax.conv_general_dilated(
            x, w, window_strides=(s, s), padding=((1, 1), (1, 1)),
            dimension_numbers=("NCHW", "OIHW", "NCHW"))
        return jax.nn.relu(y + b[None, :, None, None])
    return conv(conv(x, w1, b1, stride), w2, b2, 1)


if __name__ == "__main__":
    key = jax.random.PRNGKey(0)
    kx, kp = jax.random.split(key)

    N, C, H, W = 2, 4, 16, 16
    x = jax.random.normal(kx, (N, C, H, W), jnp.float32)
    params = init_downsample_params(kp, in_channels=C, kernel_size=3, stride=2)

    out = downsample_forward(x, params["w1"], params["b1"],
                             params["w2"], params["b2"],
                             stride=params["stride"])
    out = jax.block_until_ready(out)

    ref = _ref_forward(x, params["w1"], params["b1"],
                       params["w2"], params["b2"], stride=params["stride"])
    assert out.shape == (N, params["stride"] * C, H // 2, W // 2), out.shape
    assert jnp.allclose(out, ref, atol=1e-4, rtol=1e-4), "mismatch vs reference"

    print("KERNEL_OK")
</pallas_src>

<mosaic_0001>
module attributes {stable_mosaic.version = 11 : i64} {
  func.func @_matmul_bias_relu_kernel(%arg0: i32, %arg1: i32, %arg2: memref<128x36xf32, #tpu.memory_space<vmem>>, %arg3: memref<36x128xf32, #tpu.memory_space<vmem>>, %arg4: memref<1x128xf32, #tpu.memory_space<vmem>>, %arg5: memref<128x128xf32, #tpu.memory_space<vmem>>) attributes {dimension_semantics = [#tpu.dimension_semantics<parallel>, #tpu.dimension_semantics<parallel>], iteration_bounds = array<i64: 1, 1>, scalar_prefetch = 0 : i64, scratch_operands = 0 : i64, tpu.core_type = #tpu.core_type<tc>, window_params = [{transform_indices = @transform_0, window_bounds = array<i64: 128, 36>}, {transform_indices = @transform_1, window_bounds = array<i64: 36, 128>}, {transform_indices = @transform_2, window_bounds = array<i64: 1, 128>}, {transform_indices = @transform_3, window_bounds = array<i64: 128, 128>}]} {
    %c0 = arith.constant 0 : index
    %c0_0 = arith.constant 0 : index
    %0 = vector.load %arg2[%c0, %c0_0] : memref<128x36xf32, #tpu.memory_space<vmem>>, vector<128x36xf32>
    %c0_1 = arith.constant 0 : index
    %c0_2 = arith.constant 0 : index
    %1 = vector.load %arg3[%c0_1, %c0_2] : memref<36x128xf32, #tpu.memory_space<vmem>>, vector<36x128xf32>
    %cst = arith.constant dense<0.000000e+00> : vector<128x128xf32>
    %2 = tpu.matmul %0, %1, %cst {dimension_numbers = #tpu.dot_dimension_numbers<[1], [0], [0], [1], [0, 0, 1, 1], [], []>} : vector<128x36xf32>, vector<36x128xf32>, vector<128x128xf32> -> vector<128x128xf32>
    %c0_3 = arith.constant 0 : index
    %c0_4 = arith.constant 0 : index
    %3 = vector.load %arg4[%c0_3, %c0_4] : memref<1x128xf32, #tpu.memory_space<vmem>>, vector<1x128xf32>
    %4 = vector.broadcast %3 : vector<1x128xf32> to vector<128x128xf32>
    %5 = arith.addf %2, %4 : vector<128x128xf32>
    %cst_5 = arith.constant 0.000000e+00 : f32
    %6 = vector.broadcast %cst_5 : f32 to vector<128x128xf32>
    %7 = arith.maximumf %5, %6 : vector<128x128xf32>
    %c0_6 = arith.constant 0 : index
    %c0_7 = arith.constant 0 : index
    %8 = vector.load %arg5[%c0_6, %c0_7] : memref<128x128xf32, #tpu.memory_space<vmem>>, vector<128x128xf32>
    tpu.vector_store %arg5[%c0_6, %c0_7], %7 {strides = array<i32>} : memref<128x128xf32, #tpu.memory_space<vmem>>, vector<128x128xf32>,
    return
  }
  func.func @transform_0(%arg0: i32, %arg1: i32) -> (i32, i32) {
    %c0_i32 = arith.constant 0 : i32
    %c0_i32_0 = arith.constant 0 : i32
    return %arg0, %c0_i32 : i32, i32
  }
  func.func @transform_1(%arg0: i32, %arg1: i32) -> (i32, i32) {
    %c0_i32 = arith.constant 0 : i32
    %c0_i32_0 = arith.constant 0 : i32
    return %c0_i32, %arg1 : i32, i32
  }
  func.func @transform_2(%arg0: i32, %arg1: i32) -> (i32, i32) {
    %c0_i32 = arith.constant 0 : i32
    %c0_i32_0 = arith.constant 0 : i32
    return %c0_i32, %arg1 : i32, i32
  }
  func.func @transform_3(%arg0: i32, %arg1: i32) -> (i32, i32) {
    %c0_i32 = arith.constant 0 : i32
    return %arg0, %arg1 : i32, i32
  }
}

</mosaic_0001>

<bundles_post_ra>
// kernel: downsample_forward.2
= control target key start
LH: loop header
LB: loop body
LE: loop exit
PB: predicated region body
PF: predicated region fallthrough
CT: control target
= control target key end

     0   :  { %vm42_vm0 = vcmask 293888   ;;  %vm91_vm1 = vcmask 1043456   ;;  %s513_s1 = inlined_call_operand.vmem [shape: f32[36,128], index: 1, kind: input, shape index: {}]   ;;  %s514_s0 = inlined_call_operand.vmem [shape: f32[128,36], index: 0, kind: input, shape index: {}]   ;;  %s515_s2 = inlined_call_operand.vmem [shape: f32[1,128], index: 2, kind: input, shape index: {}]   ;;  %s516_s3 = inlined_call_operand.vmem [shape: f32[128,128], index: 3, kind: output, shape index: {}]  }
   0x1   :  { %v30_v0 = vld [vmem:[%s513_s1] sm:$0xff]  ;;  %v31_v1 = vld [vmem:[%s513_s1 + $0x8] sm:$0xff]  ;;  %v32_v2 = vld [vmem:[%s513_s1 + $0x10] sm:$0xff] }
   0x2   :  { %v349_v3 = vpack.c.bf16 %v31_v1, %v30_v0  ;;  %v33_v4 = vld [vmem:[%s513_s1 + $0x18] sm:$0xff]  ;;  %v14_v5 = vld [vmem:[%s514_s0] sm:$0xff]  ;;  %v15_v9 = vld [vmem:[%s514_s0 + $0x8] sm:$0xff] }
   0x3   :  { %v353_v6 = vpack.c.bf16 %v33_v4, %v32_v2  ;;  %325 = vmatprep.mubr.msk.f32.mxu0 %vm42_vm0, %v14_v5  ;;  %v22_v7 = vld [vmem:[%s514_s0 + $0x40] sm:$0xff]  ;;  %v23_v10 = vld [vmem:[%s514_s0 + $0x48] sm:$0xff]  ;;  %v16_v11 = vld [vmem:[%s514_s0 + $0x10] sm:$0xff] }
   0x4   :  { %350 = vmatprep.subr.bf16.mxu0 %v349_v3  ;;  %357 = vmatprep.subr.bf16.mxu1 %v349_v3  ;;  %v34_v8 = vld [vmem:[%s513_s1 + $0x20] sm:$0xf]  ;;  %v24_v12 = vld [vmem:[%s514_s0 + $0x50] sm:$0xff]  ;;  %v17_v13 = vld [vmem:[%s514_s0 + $0x18] sm:$0xff] }
   0x5   :  { %352 = vmatpush3.bf16.msra.mxu0 %v349_v3  ;;  %360 = vmatpush3.bf16.msra.mxu1 %v349_v3  ;;  %v25_v14 = vld [vmem:[%s514_s0 + $0x58] sm:$0xff]  ;;  %v18_v15 = vld [vmem:[%s514_s0 + $0x20] sm:$0xff]  ;;  %v19_v17 = vld [vmem:[%s514_s0 + $0x28] sm:$0xff] }
   0x6   :  { %354 = vmatprep.subr.bf16.mxu0 %v353_v6  ;;  %358 = vmatprep.subr.bf16.mxu1 %v353_v6  ;;  %v26_v16 = vld [vmem:[%s514_s0 + $0x60] sm:$0xff]  ;;  %v27_v18 = vld [vmem:[%s514_s0 + $0x68] sm:$0xff]  ;;  %v20_v19 = vld [vmem:[%s514_s0 + $0x30] sm:$0xff] }
   0x7   :  { %337 = vmatprep.mubr.msk.f32.mxu1 %vm42_vm0, %v22_v7  ;;  %v28_v20 = vld [vmem:[%s514_s0 + $0x70] sm:$0xff]  ;;  %v21_v21 = vld [vmem:[%s514_s0 + $0x38] sm:$0xff]  ;;  %v276_v23 = vld [vmem:[%s515_s2] ss:$0 sm:$0xff] }
   0x8   :  { %v29_v22 = vld [vmem:[%s514_s0 + $0x78] sm:$0xff] }
   0x9   :  { %356 = vmatpush3.bf16.msra.mxu0 %v353_v6  ;;  %361 = vmatpush3.bf16.msra.mxu1 %v353_v6 }
   0xa   :  { %323 = vmatprep.subr.msk.mxu0 %vm91_vm1, %v34_v8  ;;  %359 = vmatprep.subr.msk.mxu1 %vm91_vm1, %v34_v8 }
   0xd   :  { %324 = vmatpush3.msk.msra.mxu0 %vm91_vm1, %v34_v8  ;;  %362 = vmatpush3.msk.msra.mxu1 %vm91_vm1, %v34_v8 }
   0xe   :  { %326 = vmatmul.mubr.msk.f32.vlgmr.msra.gmra.mrb[0].mxu0 %vm42_vm0, %v15_v9  ;;  %338 = vmatmul.mubr.msk.f32.vlgmr.msra.gmra.mrb[0].mxu1 %vm42_vm0, %v23_v10 }
   0xf   :  { %328 = vmatprep.mubr.msk.f32.mxu0 %vm42_vm0, %v16_v11  ;;  %340 = vmatprep.mubr.msk.f32.mxu1 %vm42_vm0, %v24_v12 }
  0x12   :  { %329 = vmatmul.mubr.msk.f32.gmra.mrb[2].mxu0 %vm42_vm0, %v17_v13  ;;  %341 = vmatmul.mubr.msk.f32.gmra.mrb[2].mxu1 %vm42_vm0, %v25_v14 }
  0x13   :  { %331 = vmatprep.mubr.msk.f32.mxu0 %vm42_vm0, %v18_v15  ;;  %343 = vmatprep.mubr.msk.f32.mxu1 %vm42_vm0, %v26_v16 }
  0x16   :  { %332 = vmatmul.mubr.msk.f32.gmra.mrb[4].mxu0 %vm42_vm0, %v19_v17  ;;  %344 = vmatmul.mubr.msk.f32.gmra.mrb[4].mxu1 %vm42_vm0, %v27_v18 }
  0x17   :  { %334 = vmatprep.mubr.msk.f32.mxu0 %vm42_vm0, %v20_v19  ;;  %346 = vmatprep.mubr.msk.f32.mxu1 %vm42_vm0, %v28_v20 }
  0x1a   :  { %335 = vmatmul.mubr.msk.f32.gmra.mrb[6].mxu0 %vm42_vm0, %v21_v21  ;;  %347 = vmatmul.mubr.msk.f32.gmra.mrb[6].mxu1 %vm42_vm0, %v29_v22 }
  0xe1   :  { %v327_v24 = vpop.f32.mrb[0].mxu0  ;;  %v339_v25 = vpop.f32.mrb[0].mxu1 }
  0xe2   :  { %v167_v26 = vadd.f32 %v327_v24, %v276_v23  ;;  %v207_v27 = vadd.f32 %v339_v25, %v276_v23  ;;  %v161_v28 = vpop.f32.mrb[1].mxu0  ;;  %v201_v29 = vpop.f32.mrb[1].mxu1 }
  0xe3   :  { %v162_v30 = vadd.f32 %v276_v23, %v161_v28  ;;  %v202_v31 = vadd.f32 %v276_v23, %v201_v29 }
  0xe4   :  { %v241_v32 = vmax.f32 %v167_v26, 0.0  ;;  %v249_v33 = vmax.f32 %v207_v27, 0.0 }
  0xe5   :  { %v240_v34 = vmax.f32 %v162_v30, 0.0  ;;  %v248_v35 = vmax.f32 %v202_v31, 0.0  ;;  %v330_v36 = vpop.f32.mrb[2].mxu0  ;;  %v342_v37 = vpop.f32.mrb[2].mxu1 }
  0xe6   :  { %257 = vst [vmem:[%s516_s3 + $0x8] sm:$0xff] %v241_v32  ;;  %265 = vst [vmem:[%s516_s3 + $0x48] sm:$0xff] %v249_v33  ;;  %v177_v38 = vadd.f32 %v330_v36, %v276_v23  ;;  %v217_v39 = vadd.f32 %v342_v37, %v276_v23  ;;  %v171_v40 = vpop.f32.mrb[3].mxu0  ;;  %v211_v41 = vpop.f32.mrb[3].mxu1 }
  0xe7   :  { %256 = vst [vmem:[%s516_s3] sm:$0xff] %v240_v34  ;;  %264 = vst [vmem:[%s516_s3 + $0x40] sm:$0xff] %v248_v35  ;;  %v172_v42 = vadd.f32 %v276_v23, %v171_v40  ;;  %v212_v43 = vadd.f32 %v276_v23, %v211_v41 }
  0xe8   :  { %v243_v44 = vmax.f32 %v177_v38, 0.0  ;;  %v251_v45 = vmax.f32 %v217_v39, 0.0 }
  0xe9   :  { %v242_v46 = vmax.f32 %v172_v42, 0.0  ;;  %v250_v47 = vmax.f32 %v212_v43, 0.0  ;;  %v333_v48 = vpop.f32.mrb[4].mxu0  ;;  %v345_v49 = vpop.f32.mrb[4].mxu1 }
  0xea   :  { %259 = vst [vmem:[%s516_s3 + $0x18] sm:$0xff] %v243_v44  ;;  %267 = vst [vmem:[%s516_s3 + $0x58] sm:$0xff] %v251_v45  ;;  %v187_v50 = vadd.f32 %v333_v48, %v276_v23  ;;  %v227_v51 = vadd.f32 %v345_v49, %v276_v23  ;;  %v181_v52 = vpop.f32.mrb[5].mxu0  ;;  %v221_v53 = vpop.f32.mrb[5].mxu1 }
  0xeb   :  { %258 = vst [vmem:[%s516_s3 + $0x10] sm:$0xff] %v242_v46  ;;  %266 = vst [vmem:[%s516_s3 + $0x50] sm:$0xff] %v250_v47  ;;  %v182_v54 = vadd.f32 %v276_v23, %v181_v52  ;;  %v222_v55 = vadd.f32 %v276_v23, %v221_v53 }
  0xec   :  { %v245_v56 = vmax.f32 %v187_v50, 0.0  ;;  %v253_v57 = vmax.f32 %v227_v51, 0.0 }
  0xed   :  { %v244_v58 = vmax.f32 %v182_v54, 0.0  ;;  %v252_v59 = vmax.f32 %v222_v55, 0.0  ;;  %v336_v60 = vpop.f32.mrb[6].mxu0  ;;  %v348_v61 = vpop.f32.mrb[6].mxu1 }
  0xee   :  { %261 = vst [vmem:[%s516_s3 + $0x28] sm:$0xff] %v245_v56  ;;  %269 = vst [vmem:[%s516_s3 + $0x68] sm:$0xff] %v253_v57  ;;  %v197_v62 = vadd.f32 %v336_v60, %v276_v23  ;;  %v237_v63 = vadd.f32 %v348_v61, %v276_v23  ;;  %v191_v0 = vpop.f32.mrb[7].mxu0  ;;  %v231_v1 = vpop.f32.mrb[7].mxu1 }
  0xef   :  { %260 = vst [vmem:[%s516_s3 + $0x20] sm:$0xff] %v244_v58  ;;  %268 = vst [vmem:[%s516_s3 + $0x60] sm:$0xff] %v252_v59  ;;  %v192_v2 = vadd.f32 %v276_v23, %v191_v0  ;;  %v232_v3 = vadd.f32 %v276_v23, %v231_v1 }
  0xf0   :  { %v247_v4 = vmax.f32 %v197_v62, 0.0  ;;  %v255_v5 = vmax.f32 %v237_v63, 0.0 }
  0xf1   :  { %v246_v6 = vmax.f32 %v192_v2, 0.0  ;;  %v254_v7 = vmax.f32 %v232_v3, 0.0 }
  0xf2   :  { %263 = vst [vmem:[%s516_s3 + $0x38] sm:$0xff] %v247_v4  ;;  %271 = vst [vmem:[%s516_s3 + $0x78] sm:$0xff] %v255_v5 }
  0xf3   :  { %262 = vst [vmem:[%s516_s3 + $0x30] sm:$0xff] %v246_v6  ;;  %270 = vst [vmem:[%s516_s3 + $0x70] sm:$0xff] %v254_v7 }

</bundles_post_ra>
